<compile_context>
chip_gen: v7x
topology: tpu7x:2x2x1
jax: 0.10.0
libtpu: 0.0.40
codegen_flags: <defaults>
</compile_context>

<pallas_src>
import functools

import jax
import jax.numpy as jnp
from jax.experimental import pallas as pl
from jax.experimental.pallas import tpu as pltpu

LANE = 128
_VMEM_LIMIT = 32 * 1024 * 1024


# ----------------------------- Pallas kernels ------------------------------

def _mm_bn_kernel(x_ref, w_ref, b_ref, o_ref, *, relu):
    """out = [relu]( x @ w + shift )   (BN scale pre-folded into w)"""
    y = jnp.dot(x_ref[...], w_ref[...], preferred_element_type=jnp.float32)
    y = y + b_ref[...]
    if relu:
        y = jnp.maximum(y, 0.0)
    o_ref[...] = y.astype(o_ref.dtype)


def _mm_bn_res_kernel(x_ref, w_ref, b_ref, r_ref, o_ref):
    """out = relu( x @ w + shift + residual )   (identity shortcut)"""
    y = jnp.dot(x_ref[...], w_ref[...], preferred_element_type=jnp.float32)
    y = y + b_ref[...] + r_ref[...].astype(jnp.float32)
    o_ref[...] = jnp.maximum(y, 0.0).astype(o_ref.dtype)


def _mm_bn_proj_kernel(x_ref, w_ref, b_ref, xs_ref, wsc_ref, bsc_ref, o_ref):
    """out = relu( x @ w + b  +  xs @ wsc + bsc )   (projection shortcut fused)"""
    y = jnp.dot(x_ref[...], w_ref[...], preferred_element_type=jnp.float32)
    y = y + b_ref[...]
    y = y + jnp.dot(xs_ref[...], wsc_ref[...],
                    preferred_element_type=jnp.float32)
    y = y + bsc_ref[...]
    o_ref[...] = jnp.maximum(y, 0.0).astype(o_ref.dtype)


def _conv3x3_kernel(x_ref, w_ref, b_ref, o_ref, *, stride, Ho, Wo):
    """3x3 conv (pad=1, stride) as 9 accumulating MXU matmuls + shift + relu.

    x_ref: (1, s*s, Hq, Wq, Cin) phase-decomposed, spatially-padded input
    w_ref: (9, Cin, tn) scale-folded weights; b_ref: (1, tn)
    o_ref: (1, Ho, Wo, tn)
    """
    cin = x_ref.shape[-1]
    tn = w_ref.shape[-1]
    # Load each spatial phase once; all tap accesses below are contiguous.
    phase = [x_ref[0, k] for k in range(stride * stride)]   # (Hq, Wq, Cin)
    acc = jnp.zeros((Ho * Wo, tn), jnp.float32)
    for dy in range(3):
        for dx in range(3):
            py, qy = dy % stride, dy // stride
            px, qx = dx % stride, dx // stride
            patch = phase[py * stride + px][qy:qy + Ho, qx:qx + Wo, :]
            acc = acc + jnp.dot(patch.reshape(Ho * Wo, cin),
                                w_ref[dy * 3 + dx],
                                preferred_element_type=jnp.float32)
    y = jnp.maximum(acc + b_ref[...], 0.0)
    o_ref[0] = y.reshape(Ho, Wo, tn).astype(o_ref.dtype)


# ------------------------------ tiling helpers ------------------------------

def _round_up(v, m):
    return (v + m - 1) // m * m


def _pad_axis(x, axis, target):
    pad = target - x.shape[axis]
    if pad == 0:
        return x
    widths = [(0, 0)] * x.ndim
    widths[axis] = (0, pad)
    return jnp.pad(x, widths)


def _choose_tm(m):
    # Largest row tile that still leaves >= 2 grid steps (both v7x cores),
    # capped at 512 so (tm,K)+(tm,tn) double-buffered tiles stay well inside
    # VMEM even for layer4-sized channel counts.
    for t in (512, 256, 128, 64, 32, 16, 8):
        if m >= 2 * t:
            return t
    return 8


def _choose_tn(c):
    return 256 if c % 256 == 0 else 128


# ------------------------------ kernel wrappers ------------------------------

def matmul_bn(x, w, b, *, relu=True, out_dtype=jnp.float32,
              xs=None, wsc=None, bsc=None, residual=None):
    """Fused relu((x@w)+b [+ residual | + (xs@wsc)+bsc]) via pallas_call.

    x: (M, K) bf16, w: (K, C) bf16, b: (1, C) f32; K, C multiples of 128.
    """
    M, K = x.shape
    C = w.shape[1]
    tm = _choose_tm(M)
    tn = _choose_tn(C)
    Mp = _round_up(M, tm)
    x = _pad_axis(x, 0, Mp)

    in_specs = [
        pl.BlockSpec((tm, K), lambda i, j: (i, 0)),
        pl.BlockSpec((K, tn), lambda i, j: (0, j)),
        pl.BlockSpec((1, tn), lambda i, j: (0, j)),
    ]
    args = [x, w, b]

    if xs is not None:                       # fused projection shortcut
        kernel = _mm_bn_proj_kernel
        Ks = xs.shape[1]
        xs = _pad_axis(xs, 0, Mp)
        in_specs += [
            pl.BlockSpec((tm, Ks), lambda i, j: (i, 0)),
            pl.BlockSpec((Ks, tn), lambda i, j: (0, j)),
            pl.BlockSpec((1, tn), lambda i, j: (0, j)),
        ]
        args += [xs, wsc, bsc]
    elif residual is not None:               # identity shortcut
        kernel = _mm_bn_res_kernel
        residual = _pad_axis(residual, 0, Mp)
        in_specs.append(pl.BlockSpec((tm, tn), lambda i, j: (i, j)))
        args.append(residual)
    else:
        kernel = functools.partial(_mm_bn_kernel, relu=relu)

    out = pl.pallas_call(
        kernel,
        out_shape=jax.ShapeDtypeStruct((Mp, C), out_dtype),
        grid=(Mp // tm, C // tn),
        in_specs=in_specs,
        out_specs=pl.BlockSpec((tm, tn), lambda i, j: (i, j)),
        compiler_params=pltpu.CompilerParams(
            dimension_semantics=("parallel", "parallel"),
            vmem_limit_bytes=_VMEM_LIMIT),
    )(*args)
    return out[:M]


def conv3x3_bn_relu(h1, w2, b2, stride):
    """3x3 conv (pad=1, stride in {1,2}) + folded BN + relu, no HBM im2col.

    h1: (N, H, W, Cin) bf16 (Cin a multiple of 128), w2: (9, Cin, Cout) bf16,
    b2: (1, Cout) f32.  Returns (N, Ho, Wo, Cout) bf16.
    """
    N, H, W, Cin = h1.shape
    Cout = w2.shape[-1]
    Ho = (H - 1) // stride + 1
    Wo = (W - 1) // stride + 1
    Hq = Ho + 2 // stride
    Wq = Wo + 2 // stride

    # Spatial zero-pad + space-to-batch phase decomposition (~1x HBM traffic,
    # all in-kernel tap reads become contiguous unit-stride slices).
    h1p = jnp.pad(h1, ((0, 0), (1, 1), (1, 1), (0, 0)))
    phases = []
    for py in range(stride):
        for px in range(stride):
            phases.append(h1p[:, py:py + stride * Hq:stride,
                              px:px + stride * Wq:stride, :])
    xph = jnp.stack(phases, axis=1)          # (N, s*s, Hq, Wq, Cin)

    tn = _choose_tn(Cout)
    kernel = functools.partial(_conv3x3_kernel, stride=stride, Ho=Ho, Wo=Wo)
    return pl.pallas_call(
        kernel,
        out_shape=jax.ShapeDtypeStruct((N, Ho, Wo, Cout), jnp.bfloat16),
        grid=(N, Cout // tn),
        in_specs=[
            pl.BlockSpec((1, stride * stride, Hq, Wq, Cin),
                         lambda n, j: (n, 0, 0, 0, 0)),
            pl.BlockSpec((9, Cin, tn), lambda n, j: (0, 0, j)),
            pl.BlockSpec((1, tn), lambda n, j: (0, j)),
        ],
        out_specs=pl.BlockSpec((1, Ho, Wo, tn), lambda n, j: (n, 0, 0, j)),
        compiler_params=pltpu.CompilerParams(
            dimension_semantics=("parallel", "parallel"),
            vmem_limit_bytes=_VMEM_LIMIT),
    )(xph, w2, b2)


# ------------------------------- forward pass -------------------------------

def bottleneck_forward(x_nchw, p, stride):
    """Pallas implementation of Bottleneck.forward (inference). NCHW in/out."""
    x = jnp.transpose(x_nchw, (0, 2, 3, 1))          # -> NHWC
    N, H, W, Cin = x.shape
    planes = p["w1"].shape[1]
    exp_c = p["w3"].shape[1]

    Cin_p = _round_up(Cin, LANE)
    Cp1 = _round_up(planes, LANE)
    Cp3 = _round_up(exp_c, LANE)

    x_bf = _pad_axis(x.astype(jnp.bfloat16), 3, Cin_p)

    def fold_w(w, scale, cin_t, cout_t):
        ws = (w * scale).astype(jnp.bfloat16)        # BN scale folded into w
        ws = _pad_axis(ws, ws.ndim - 2, cin_t)
        ws = _pad_axis(ws, ws.ndim - 1, cout_t)
        return ws

    def pad_b(b, c_t):
        return _pad_axis(b.astype(jnp.float32), 0, c_t).reshape(1, c_t)

    w1 = fold_w(p["w1"], p["s1"][None, :], Cin_p, Cp1)
    w2 = fold_w(p["w2"], p["s2"][None, None, None, :], Cp1, Cp1)
    w2 = w2.reshape(9, Cp1, Cp1)
    w3 = fold_w(p["w3"], p["s3"][None, :], Cp1, Cp3)
    b1, b2, b3 = pad_b(p["b1"], Cp1), pad_b(p["b2"], Cp1), pad_b(p["b3"], Cp3)

    # conv1 (1x1) + bn1 + relu
    h1 = matmul_bn(x_bf.reshape(N * H * W, Cin_p), w1, b1,
                   relu=True, out_dtype=jnp.bfloat16)
    h1 = h1.reshape(N, H, W, Cp1)

    # conv2 (3x3, stride, pad=1) + bn2 + relu — 9 accumulating in-kernel dots
    h2 = conv3x3_bn_relu(h1, w2, b2, stride)         # (N, Ho, Wo, Cp1) bf16
    _, Ho, Wo, _ = h2.shape
    h2 = h2.reshape(N * Ho * Wo, Cp1)

    # conv3 (1x1) + bn3 + shortcut + add + relu, fully fused in one kernel
    if stride != 1 or Cin != exp_c:
        xs = x_bf[:, ::stride, ::stride, :].reshape(N * Ho * Wo, Cin_p)
        wsc = fold_w(p["wsc"], p["ssc"][None, :], Cin_p, Cp3)
        bsc = pad_b(p["bsc"], Cp3)
        out = matmul_bn(h2, w3, b3, out_dtype=jnp.float32,
                        xs=xs, wsc=wsc, bsc=bsc)
    else:
        res = x_bf.reshape(N * H * W, Cin_p)
        out = matmul_bn(h2, w3, b3, out_dtype=jnp.float32, residual=res)

    out = out.reshape(N, Ho, Wo, Cp3)[..., :exp_c]
    return jnp.transpose(out, (0, 3, 1, 2))          # -> NCHW


# ---------------------------- pure-JAX reference ----------------------------

def reference_forward(x_nchw, p, stride):
    """Pure-XLA reference with the same precision policy as the Pallas path
    (bf16 matmul operands, f32 accumulation, folded inference-mode BN)."""
    x = jnp.transpose(x_nchw, (0, 2, 3, 1))
    bf = lambda a: a.astype(jnp.bfloat16)

    def conv(h, w, s, pad):
        return jax.lax.conv_general_dilated(
            bf(h), bf(w), (s, s), pad,
            dimension_numbers=("NHWC", "HWIO", "NHWC"),
            preferred_element_type=jnp.float32)

    w1 = (p["w1"] * p["s1"][None, :])[None, None]
    h = jax.nn.relu(conv(x, w1, 1, "VALID") + p["b1"])
    w2 = p["w2"] * p["s2"][None, None, None, :]
    h = jax.nn.relu(conv(h, w2, stride, ((1, 1), (1, 1))) + p["b2"])
    w3 = (p["w3"] * p["s3"][None, :])[None, None]
    h = conv(h, w3, 1, "VALID") + p["b3"]

    in_planes, exp_c = p["w1"].shape[0], p["w3"].shape[1]
    if stride != 1 or in_planes != exp_c:
        wsc = (p["wsc"] * p["ssc"][None, :])[None, None]
        sc = conv(x, wsc, stride, "VALID") + p["bsc"]
    else:
        sc = bf(x).astype(jnp.float32)
    out = jax.nn.relu(h + sc)
    return jnp.transpose(out, (0, 3, 1, 2))


# --------------------------------- main -------------------------------------

def make_params(key, in_planes, planes, expansion=4):
    ks = jax.random.split(key, 8)
    exp_c = expansion * planes

    def bn_params(k, c):
        k1, k2, k3, k4 = jax.random.split(k, 4)
        gamma = 1.0 + 0.1 * jax.random.normal(k1, (c,), jnp.float32)
        beta = 0.1 * jax.random.normal(k2, (c,), jnp.float32)
        mean = 0.1 * jax.random.normal(k3, (c,), jnp.float32)
        var = jax.random.uniform(k4, (c,), jnp.float32, 0.5, 1.5)
        scale = gamma / jnp.sqrt(var + 1e-5)
        shift = beta - mean * scale
        return scale, shift

    p = {}
    p["w1"] = 0.2 * jax.random.normal(ks[0], (in_planes, planes), jnp.float32)
    p["s1"], p["b1"] = bn_params(ks[1], planes)
    p["w2"] = 0.2 * jax.random.normal(ks[2], (3, 3, planes, planes), jnp.float32)
    p["s2"], p["b2"] = bn_params(ks[3], planes)
    p["w3"] = 0.2 * jax.random.normal(ks[4], (planes, exp_c), jnp.float32)
    p["s3"], p["b3"] = bn_params(ks[5], exp_c)
    p["wsc"] = 0.2 * jax.random.normal(ks[6], (in_planes, exp_c), jnp.float32)
    p["ssc"], p["bsc"] = bn_params(ks[7], exp_c)
    return p


if __name__ == "__main__":
    key = jax.random.PRNGKey(0)
    k_x, k_p = jax.random.split(key)

    N, in_planes, H, W = 2, 4, 16, 16
    planes, stride = 4, 2

    x = jax.random.normal(k_x, (N, in_planes, H, W), jnp.float32)  # NCHW
    params = make_params(k_p, in_planes, planes)

    out = jax.block_until_ready(bottleneck_forward(x, params, stride))
    ref = jax.block_until_ready(reference_forward(x, params, stride))

    assert out.shape == ref.shape, (out.shape, ref.shape)
    max_err = float(jnp.max(jnp.abs(out - ref)))
    assert jnp.allclose(out, ref, atol=1e-2, rtol=1e-2), max_err

    print("KERNEL_OK")
</pallas_src>

<mosaic_0001>
module attributes {stable_mosaic.version = 11 : i64} {
  func.func @_mm_bn_kernel(%arg0: i32, %arg1: i32, %arg2: memref<256x128xbf16, #tpu.memory_space<vmem>>, %arg3: memref<128x128xbf16, #tpu.memory_space<vmem>>, %arg4: memref<1x128xf32, #tpu.memory_space<vmem>>, %arg5: memref<256x128xbf16, #tpu.memory_space<vmem>>) attributes {dimension_semantics = [#tpu.dimension_semantics<parallel>, #tpu.dimension_semantics<parallel>], iteration_bounds = array<i64: 2, 1>, scalar_prefetch = 0 : i64, scratch_operands = 0 : i64, tpu.core_type = #tpu.core_type<tc>, window_params = [{transform_indices = @transform_0, window_bounds = array<i64: 256, 128>}, {transform_indices = @transform_1, window_bounds = array<i64: 128, 128>}, {transform_indices = @transform_2, window_bounds = array<i64: 1, 128>}, {transform_indices = @transform_3, window_bounds = array<i64: 256, 128>}]} {
    %c0 = arith.constant 0 : index
    %c0_0 = arith.constant 0 : index
    %0 = vector.load %arg2[%c0, %c0_0] : memref<256x128xbf16, #tpu.memory_space<vmem>>, vector<256x128xbf16>
    %c0_1 = arith.constant 0 : index
    %c0_2 = arith.constant 0 : index
    %1 = vector.load %arg3[%c0_1, %c0_2] : memref<128x128xbf16, #tpu.memory_space<vmem>>, vector<128x128xbf16>
    %cst = arith.constant dense<0.000000e+00> : vector<256x128xf32>
    %2 = tpu.matmul %0, %1, %cst {dimension_numbers = #tpu.dot_dimension_numbers<[1], [0], [0], [1], [0, 0, 1, 1], [], []>} : vector<256x128xbf16>, vector<128x128xbf16>, vector<256x128xf32> -> vector<256x128xf32>
    %c0_3 = arith.constant 0 : index
    %c0_4 = arith.constant 0 : index
    %3 = vector.load %arg4[%c0_3, %c0_4] : memref<1x128xf32, #tpu.memory_space<vmem>>, vector<1x128xf32>
    %4 = vector.broadcast %3 : vector<1x128xf32> to vector<256x128xf32>
    %5 = arith.addf %2, %4 : vector<256x128xf32>
    %cst_5 = arith.constant 0.000000e+00 : f32
    %6 = vector.broadcast %cst_5 : f32 to vector<256x128xf32>
    %7 = arith.maximumf %5, %6 : vector<256x128xf32>
    %8 = arith.truncf %7 : vector<256x128xf32> to vector<256x128xbf16>
    %c0_6 = arith.constant 0 : index
    %c0_7 = arith.constant 0 : index
    %9 = vector.load %arg5[%c0_6, %c0_7] : memref<256x128xbf16, #tpu.memory_space<vmem>>, vector<256x128xbf16>
    tpu.vector_store %arg5[%c0_6, %c0_7], %8 {strides = array<i32>} : memref<256x128xbf16, #tpu.memory_space<vmem>>, vector<256x128xbf16>,
    return
  }
  func.func @transform_0(%arg0: i32, %arg1: i32) -> (i32, i32) {
    %c0_i32 = arith.constant 0 : i32
    %c0_i32_0 = arith.constant 0 : i32
    return %arg0, %c0_i32 : i32, i32
  }
  func.func @transform_1(%arg0: i32, %arg1: i32) -> (i32, i32) {
    %c0_i32 = arith.constant 0 : i32
    %c0_i32_0 = arith.constant 0 : i32
    return %c0_i32, %arg1 : i32, i32
  }
  func.func @transform_2(%arg0: i32, %arg1: i32) -> (i32, i32) {
    %c0_i32 = arith.constant 0 : i32
    %c0_i32_0 = arith.constant 0 : i32
    return %c0_i32, %arg1 : i32, i32
  }
  func.func @transform_3(%arg0: i32, %arg1: i32) -> (i32, i32) {
    %c0_i32 = arith.constant 0 : i32
    return %arg0, %arg1 : i32, i32
  }
}

</mosaic_0001>

<bundles_post_ra>
// kernel: tpu_custom_call.1
= control target key start
LH: loop header
LB: loop body
LE: loop exit
PB: predicated region body
PF: predicated region fallthrough
CT: control target
= control target key end

     0   :  { %8 = vsyncpa [#allocation3], 0  ;;  %s1785_s0 = inlined_call_operand.hbm [shape: bf16[512,128], index: 0, kind: input, shape index: {}]   ;;  %s1786_s1 = inlined_call_operand.hbm [shape: bf16[128,128], index: 1, kind: input, shape index: {}]   ;;  %s1787_s2 = inlined_call_operand.vmem [shape: f32[1,128], index: 2, kind: input, shape index: {}]   ;;  %s1788_s3 = inlined_call_operand.hbm [shape: bf16[512,128], index: 3, kind: output, shape index: {}]  }
   0x1   :  { %10 = vsyncpa [#allocation3 + $0x1], 0 }
   0x2   :  { %11 = vsyncpa [#allocation6], 0 }
   0x3   :  { %12 = vsyncpa [#allocation4], 0 }
   0x4   :  { %14 = vsyncpa [#allocation4 + $0x1], 0  ;;  %s1482_s12 = smov 0   ;;  %s1484_s13 = smov 0  }
   0x5   :  { %s1486_s14 = smov 0   ;;  %s1488_s15 = smov 0  }
   0x6   :  { %s1490_s16 = smov 0   ;;  %s1492_s17 = smov 0  }
   0x7 LB: > { %s916_s18 = sadd.s32 4294967295, %s1453_s17   ;;  %s917_s19 = sadd.s32 4294967294, %s1453_s17   ;;  %s1453_s17 = sphi %s1492_s17, %s20_s17   ;;  %s1449_s16 = sphi %s1490_s16, %s1812_s16   ;;  %s1445_s15 = sphi %s1488_s15, %s1811_s15   ;;  %s1441_s14 = sphi %s1486_s14, %s1810_s14   ;;  %s1437_s13 = sphi %s1484_s13, %s1809_s13   ;;  %s1433_s12 = sphi %s1482_s12, %s1808_s12  }
   0x8   : > { %p52_p0 = scmp.ne.s32.totalorder %s1437_s13, %s1433_s12  ;;  %p1516_p1 = scmp.eq.s32.totalorder %s916_s18, 0 }
   0x9   : > { %p1520_p2 = scmp.eq.s32.totalorder %s916_s18, 1  ;;  %p136_p3 = scmp.eq.s32.totalorder %s917_s19, 1 }
   0xa   : > { %s1793_s20 = scalar_select %p1516_p1, 1, 0 }
   0xb   : > { %s1794_s21 = scalar_select %p1520_p2, 1, 0 }
   0xc   : > { %p1526_p4 = por %p1516_p1, %p52_p0  ;;  %p918_p5 = scmp.ge.s32.totalorder %s1453_s17, 1 }
   0xd   : > { %p1531_p6 = por %p136_p3, %p52_p0  ;;  %p143_p7 = scmp.lt.s32.totalorder %s1453_s17, 3 }
   0xe   : > { %s1795_s22 = scalar_select %p1526_p4, 1, 0 }
   0xf   : > { %s1796_s23 = scalar_select %p1531_p6, 1, 0 }
  0x10   : > { %p1536_p8 = pnand %p918_p5, %p143_p7  ;;  %s1455_s25 = smov [#allocation5]  }
  0x11   : > { %s157_s26 = sshll.u32 %s1455_s25, 4  ;;  %s32_s28 = sadd.s32 1, %s1449_s16  ;;  %s158_s26 = int_to_ptr.vmem [resolvable:$true] %s157_s26 }
  0x12   : > { %s1797_s24 = scalar_select %p1536_p8, 1, 0 }
  0x13   : > { %p1216_p9 = pneg %p1536_p8  ;;  %s1309_s4 = scalar_lea.hbm %s1786_s1, 1024 }
  0x14   : > { %p1310_p12 = scmp.ne.s32.totalorder %s1786_s1, %s1309_s4  ;;  %p1316_p5 = scmp.lt.u32.totalorder %s1309_s4, %s1786_s1 }
  0x15   : > { %p1545_p11 = pnand %p1216_p9, %p1516_p1 }
  0x17   : > { %p1311_p13 = pneg %p1545_p11 }
  0x19   : > { %p1312_p0 = pnand %p1311_p13, %p1310_p12 }
  0x1b   : > { %p1313_p3 = pneg %p1312_p0 }
  0x1d   : > { %p1318_p7 = pnand %p1316_p5, %p1313_p3 }
  0x1f   : > { %1321 = shalt.err (!%p1318_p7)
}
  0x20   : > { %s1322_s9 = scalar_lea.vmem %s158_s26, 1024  ;;  %p1330_p1 = scmp.lt.s32.totalorder %s158_s26, %s158_s26 }
  0x21   : > { %p1323_p9 = scmp.ne.s32.totalorder %s158_s26, %s1322_s9  ;;  %p1331_p4 = scmp.lt.s32.totalorder %s1322_s9, %s1322_s9 }
  0x23   : > { %p1325_p10 = pnand %p1323_p9, %p1311_p13  ;;  %p1332_p8 = por %p1331_p4, %p1330_p1 }
  0x25   : > { %p1326_p6 = pneg %p1325_p10 }
  0x27   : > { %p1333_p2 = pnand %p1332_p8, %p1326_p6 }
  0x29   : > { %1336 = shalt.err (!%p1333_p2)
}
  0x2a   : > { %s1456_s10 = smov 64   ;;  %s1457_s11 = smov 4  }
  0x2b   : > { %1219 = dma.hbm_to_vmem [thread:$0]  (!%p1545_p11), %s1786_s1, 1024, %s158_s26, [#allocation6], %s1456_s10, %s1456_s10, %s1457_s11  }
  0x2c   : > { %p34_p1 = scmp.ge.s32.totalorder %s32_s28, 2  ;;  %s39_s25 = sadd.s32 1, %s1441_s14 }
  0x2d   : > { %p46_p2 = scmp.ne.s32.totalorder %s1441_s14, %s1437_s13  ;;  %p47_p4 = scmp.eq.s32.totalorder %s1453_s17, 0 }
  0x2e   : > { %s1814_s28 = smov (%p34_p1, %s32_s28), 0  ;;  %p1800_p8 = scmp.ne.s32.totalorder %s1794_s21, 0 }
  0x2f   : > { %p1575_p6 = por %p47_p4, %p46_p2  ;;  %s36_s30 = ssub.s32 %s1449_s16, %s1814_s28 }
  0x30   : > { %p1581_p10 = por %p1800_p8, %p46_p2  ;;  %p1229_p12 = scmp.lt.s32.totalorder %s1453_s17, 2 }
  0x31   : > { %p37_p11 = scmp.eq.s32.totalorder %s36_s30, 0  ;;  %s177_s26 = sand.u32 1, %s1441_s14  }
  0x32   : > { %s922_s4 = sshll.u32 %s177_s26, 7  ;;  %s991_s6 = sshll.u32 %s1449_s16, 11 }
  0x33   : > { %s1590_s5 = scalar_select %p37_p11, %s1441_s14, %s39_s25  }
  0x34   : > { %s1596_s9 = scalar_lea.hbm %s1785_s0, %s991_s6  ;;  %s181_s21 = scalar_lea.vmem [#allocation2], %s922_s4 }
  0x35   : > { %s188_s18 = sshll.u32 %s181_s21, 4  ;;  %p1602_p13 = pnand %p1229_p12, %p1575_p6  ;;  %s1598_s18 = int_to_ptr.vmem [resolvable:$true] %s188_s18 }
  0x36   : > { %s1606_s25 = scalar_lea.sflag [#allocation3], %s177_s26  ;;  %s1337_s30 = scalar_lea.hbm %s1596_s9, 2048 }
  0x37   : > { %p1338_p0 = scmp.ne.s32.totalorder %s1596_s9, %s1337_s30  ;;  %p1339_p3 = pneg %p1602_p13 }
  0x38   : > { %s1342_s29 = scalar_lea.hbm %s1785_s0, 4096  ;;  %p1343_p9 = scmp.lt.u32.totalorder %s1596_s9, %s1785_s0 }
  0x39   : > { %p1340_p5 = pnand %p1339_p3, %p1338_p0  ;;  %p1344_p1 = scmp.lt.u32.totalorder %s1342_s29, %s1337_s30 }
  0x3a   : > { %p1346_p4 = scmp.lt.u32.totalorder %s1337_s30, %s1596_s9 }
  0x3b   : > { %p1341_p7 = pneg %p1340_p5  ;;  %p1345_p2 = por %p1344_p1, %p1343_p9 }
  0x3d   : > { %p1347_p6 = por %p1346_p4, %p1345_p2 }
  0x3f   : > { %p1348_p8 = pnand %p1347_p6, %p1341_p7 }
  0x41   : > { %1351 = shalt.err (!%p1348_p8)
}
  0x42   : > { %s1352_s26 = scalar_lea.vmem %s1598_s18, 2048  ;;  %s1458_s21 = smov [#allocation2]  }
  0x43   : > { %p1353_p12 = scmp.ne.s32.totalorder %s1598_s18, %s1352_s26  ;;  %s1357_s4 = sshll.u32 %s1458_s21, 4  ;;  %s1358_s4 = int_to_ptr.vmem [resolvable:$false] %s1357_s4 }
  0x44   : > { %s1359_s6 = scalar_lea.vmem %s1358_s4, 4096  ;;  %p1360_p5 = scmp.lt.s32.totalorder %s1598_s18, %s1358_s4 }
  0x45   : > { %p1355_p11 = pnand %p1353_p12, %p1339_p3  ;;  %p1361_p9 = scmp.lt.s32.totalorder %s1359_s6, %s1352_s26 }
  0x47   : > { %p1356_p0 = pneg %p1355_p11  ;;  %p1362_p1 = por %p1361_p9, %p1360_p5 }
  0x49   : > { %p1363_p2 = pnand %p1362_p1, %p1356_p0 }
  0x4b   : > { %1366 = shalt.err (!%p1363_p2)
}
  0x4c   : > { %1223 = dma.hbm_to_vmem [thread:$0]  (!%p1602_p13), %s1596_s9, 2048, %s1598_s18, %s1606_s25, %s1456_s10, %s1456_s10, %s1457_s11  }
  0x4d   : > { %p1803_p3 = scmp.ne.s32.totalorder %s1797_s24, 0 }
  0x4e   : > { %s1640_s30 = sand.u32 (!%p1803_p3), 1, %s1437_s13   ;;  %p1804_p7 = scmp.ne.s32.totalorder (!%p1803_p3), %s1795_s22, 0 }
  0x4f   : > { %200 = sbr.rel (%p1803_p3) target bundleno = 383 (0x17f), region = 32  ;;  %s926_s29 = sshll.u32 (!%p1803_p3), %s1640_s30, 7 }
  0x50   : > { %s203_s7 = scalar_lea.sflag (!%p1803_p3), [#allocation3], %s1640_s30  ;;  %s1646_s19 = scalar_lea.vmem (!%p1803_p3), [#allocation2], %s926_s29 }
  0x56   : > { %1420 = dma.done.wait (%p1804_p7), %s203_s7, 2048  }
  0x57   : > { %1422 = vsyncadd (%p1804_p7), %s203_s7, 4294965248  ;;  %p1805_p13 = scmp.ne.s32.totalorder %s1793_s20, 0 }
  0x59   : > { %1424 = dma.done.wait (%p1805_p13), [#allocation6], 1024  }
  0x5a   : > { %1426 = vsyncadd (%p1805_p13), [#allocation6], 4294966272  ;;  %v1285_v0 = vld [vmem:[#allocation5] sm:$0xff]   ;;  %v1286_v1 = vld [vmem:[#allocation5 + $0x8] sm:$0xff]   ;;  %s1687_s24 = scalar_lea.vmem [#allocation7], %s926_s29  ;;  %s1024_s10 = sshll.u32 %s1445_s15, 11 }
  0x5b   : > { %1144 = vmatprep.subr.bf16.mxu0 %v1285_v0  ;;  %1192 = vmatprep.subr.bf16.mxu1 %v1285_v0  ;;  %v1287_v2 = vld [vmem:[#allocation5 + $0x10] sm:$0xff]   ;;  %v1288_v3 = vld [vmem:[#allocation5 + $0x18] sm:$0xff]   ;;  %v1293_v4 = vld [vmem:[%s1646_s19] sm:$0xff]   ;;  %s809_s11 = sshll.u32 %s1687_s24, 4  ;;  %s1730_s15 = scalar_lea.hbm %s1788_s3, %s1024_s10  ;;  %s1732_s11 = int_to_ptr.vmem [resolvable:$true] %s809_s11 }
  0x5c   : > { %1145 = vmatpush3.bf16.msra.mxu0 %v1285_v0  ;;  %1200 = vmatpush3.bf16.msra.mxu1 %v1285_v0  ;;  %v1294_v5 = vld [vmem:[%s1646_s19 + $0x40] sm:$0xff]   ;;  %v1290_v7 = vld [vmem:[#allocation5 + $0x28] sm:$0xff]   ;;  %v1291_v8 = vld [vmem:[#allocation5 + $0x30] sm:$0xff]   ;;  %s795_s25 = scalar_lea.sflag [#allocation4], %s1640_s30  ;;  %s1367_s8 = scalar_lea.vmem %s1732_s11, 2048 }
  0x5d   : > { %1146 = vmatprep.subr.bf16.mxu0 %v1286_v1  ;;  %1193 = vmatprep.subr.bf16.mxu1 %v1286_v1  ;;  %v1289_v6 = vld [vmem:[#allocation5 + $0x20] sm:$0xff]   ;;  %v1292_v9 = vld [vmem:[#allocation5 + $0x38] sm:$0xff]   ;;  %v1295_v10 = vld [vmem:[%s1646_s19 + $0x8] sm:$0xff]   ;;  %p1368_p4 = scmp.ne.s32.totalorder %s1732_s11, %s1367_s8  ;;  %s1459_s26 = smov [#allocation7]  }
  0x5e   : > { %1160 = vmatprep.mubr.bf16.mxu0 %v1293_v4  ;;  %1176 = vmatprep.mubr.bf16.mxu1 %v1294_v5  ;;  %v1296_v11 = vld [vmem:[%s1646_s19 + $0x48] sm:$0xff]   ;;  %v1297_v12 = vld [vmem:[%s1646_s19 + $0x10] sm:$0xff]   ;;  %v1299_v14 = vld [vmem:[%s1646_s19 + $0x18] sm:$0xff]   ;;  %s1371_s21 = sshll.u32 %s1459_s26, 4  ;;  %s1372_s21 = int_to_ptr.vmem [resolvable:$false] %s1371_s21 }
  0x5f   : > { %v1298_v13 = vld [vmem:[%s1646_s19 + $0x50] sm:$0xff]   ;;  %v1300_v15 = vld [vmem:[%s1646_s19 + $0x58] sm:$0xff]   ;;  %v1301_v16 = vld [vmem:[%s1646_s19 + $0x20] sm:$0xff]   ;;  %p1369_p6 = pnand %p1368_p4, %p1581_p10  ;;  %s1373_s4 = scalar_lea.vmem %s1372_s21, 4096 }
  0x60   : > { %1147 = vmatpush3.bf16.msra.mxu0 %v1286_v1  ;;  %1201 = vmatpush3.bf16.msra.mxu1 %v1286_v1  ;;  %v1302_v17 = vld [vmem:[%s1646_s19 + $0x60] sm:$0xff]   ;;  %v1303_v18 = vld [vmem:[%s1646_s19 + $0x28] sm:$0xff]   ;;  %v1305_v20 = vld [vmem:[%s1646_s19 + $0x30] sm:$0xff]   ;;  %p1374_p12 = scmp.lt.s32.totalorder %s1732_s11, %s1372_s21  ;;  %p1375_p11 = scmp.lt.s32.totalorder %s1373_s4, %s1367_s8 }
  0x61   : > { %1148 = vmatprep.subr.bf16.mxu0 %v1287_v2  ;;  %1194 = vmatprep.subr.bf16.mxu1 %v1287_v2  ;;  %v1304_v19 = vld [vmem:[%s1646_s19 + $0x68] sm:$0xff]   ;;  %v1306_v21 = vld [vmem:[%s1646_s19 + $0x70] sm:$0xff]   ;;  %v1307_v22 = vld [vmem:[%s1646_s19 + $0x38] sm:$0xff]   ;;  %p1370_p8 = pneg %p1369_p6 }
  0x62   : > { %v1308_v23 = vld [vmem:[%s1646_s19 + $0x78] sm:$0xff]   ;;  %v1675_v24 = vld [vmem:[%s1787_s2] ss:$0 sm:$0xff]  ;;  %p1376_p0 = por %p1375_p11, %p1374_p12 }
  0x64   : > { %1149 = vmatpush3.bf16.msra.mxu0 %v1287_v2  ;;  %1202 = vmatpush3.bf16.msra.mxu1 %v1287_v2  ;;  %p1377_p5 = pnand %p1376_p0, %p1370_p8 }
  0x65   : > { %1150 = vmatprep.subr.bf16.mxu0 %v1288_v3  ;;  %1195 = vmatprep.subr.bf16.mxu1 %v1288_v3 }
  0x68   : > { %1151 = vmatpush3.bf16.msra.mxu0 %v1288_v3  ;;  %1203 = vmatpush3.bf16.msra.mxu1 %v1288_v3 }
  0x69   : > { %1152 = vmatprep.subr.bf16.mxu0 %v1289_v6  ;;  %1196 = vmatprep.subr.bf16.mxu1 %v1289_v6 }
  0x6c   : > { %1153 = vmatpush3.bf16.msra.mxu0 %v1289_v6  ;;  %1204 = vmatpush3.bf16.msra.mxu1 %v1289_v6 }
  0x6d   : > { %1154 = vmatprep.subr.bf16.mxu0 %v1290_v7  ;;  %1197 = vmatprep.subr.bf16.mxu1 %v1290_v7 }
  0x70   : > { %1155 = vmatpush3.bf16.msra.mxu0 %v1290_v7  ;;  %1205 = vmatpush3.bf16.msra.mxu1 %v1290_v7 }
  0x71   : > { %1156 = vmatprep.subr.bf16.mxu0 %v1291_v8  ;;  %1198 = vmatprep.subr.bf16.mxu1 %v1291_v8 }
  0x74   : > { %1157 = vmatpush3.bf16.msra.mxu0 %v1291_v8  ;;  %1206 = vmatpush3.bf16.msra.mxu1 %v1291_v8 }
  0x75   : > { %1158 = vmatprep.subr.bf16.mxu0 %v1292_v9  ;;  %1199 = vmatprep.subr.bf16.mxu1 %v1292_v9 }
  0x78   : > { %1159 = vmatpush3.bf16.msra.mxu0 %v1292_v9  ;;  %1207 = vmatpush3.bf16.msra.mxu1 %v1292_v9 }
  0x7b   : > { %1161 = vmatmul.mubr.bf16.vlgmr.msra.gmra.mrb[0].mxu0 %v1295_v10  ;;  %1177 = vmatmul.mubr.bf16.vlgmr.msra.gmra.mrb[0].mxu1 %v1296_v11 }
  0x7c   : > { %1164 = vmatprep.mubr.bf16.mxu0 %v1297_v12  ;;  %1180 = vmatprep.mubr.bf16.mxu1 %v1298_v13 }
  0x83   : > { %1165 = vmatmul.mubr.bf16.gmra.mrb[4].mxu0 %v1299_v14  ;;  %1181 = vmatmul.mubr.bf16.gmra.mrb[4].mxu1 %v1300_v15 }
  0x84   : > { %1168 = vmatprep.mubr.bf16.mxu0 %v1301_v16  ;;  %1184 = vmatprep.mubr.bf16.mxu1 %v1302_v17 }
  0x8b   : > { %1169 = vmatmul.mubr.bf16.gmra.mrb[8].mxu0 %v1303_v18  ;;  %1185 = vmatmul.mubr.bf16.gmra.mrb[8].mxu1 %v1304_v19 }
  0x8c   : > { %1172 = vmatprep.mubr.bf16.mxu0 %v1305_v20  ;;  %1188 = vmatprep.mubr.bf16.mxu1 %v1306_v21 }
  0x93   : > { %1173 = vmatmul.mubr.bf16.gmra.mrb[12].mxu0 %v1307_v22  ;;  %1189 = vmatmul.mubr.bf16.gmra.mrb[12].mxu1 %v1308_v23 }
 0x14e   : > { %v1162_v25 = vpop.f32.mrb[0].mxu0  ;;  %v1178_v26 = vpop.f32.mrb[0].mxu1 }
 0x14f   : > { %v484_v27 = vadd.f32 %v1162_v25, %v1675_v24  ;;  %v548_v28 = vadd.f32 %v1178_v26, %v1675_v24  ;;  %v475_v29 = vpop.f32.mrb[1].mxu0  ;;  %v539_v30 = vpop.f32.mrb[1].mxu1 }
 0x150   : > { %v476_v31 = vadd.f32 %v1675_v24, %v475_v29  ;;  %v540_v32 = vadd.f32 %v1675_v24, %v539_v30  ;;  %v1163_v33 = vpop.f32.mrb[2].mxu0  ;;  %v1179_v34 = vpop.f32.mrb[2].mxu1 }
 0x151   : > { %v487_v35 = vadd.f32 %v1163_v33, %v1675_v24  ;;  %v551_v36 = vadd.f32 %v1179_v34, %v1675_v24  ;;  %v478_v37 = vpop.f32.mrb[3].mxu0  ;;  %v542_v38 = vpop.f32.mrb[3].mxu1  ;;  %v604_v41 = vmax.f32 %v484_v27, 0.0  ;;  %v620_v42 = vmax.f32 %v548_v28, 0.0 }
 0x152   : > { %v479_v39 = vadd.f32 %v1675_v24, %v478_v37  ;;  %v543_v40 = vadd.f32 %v1675_v24, %v542_v38  ;;  %v602_v45 = vmax.f32 %v476_v31, 0.0  ;;  %v618_v46 = vmax.f32 %v540_v32, 0.0 }
 0x153   : > { %v605_v43 = vmax.f32 %v487_v35, 0.0  ;;  %v621_v44 = vmax.f32 %v551_v36, 0.0 }
 0x154   : > { %v603_v47 = vmax.f32 %v479_v39, 0.0  ;;  %v619_v48 = vmax.f32 %v543_v40, 0.0 }
 0x155   : > { %v1033_v49 = vpack.c.bf16 %v605_v43, %v604_v41  ;;  %v1073_v50 = vpack.c.bf16 %v621_v44, %v620_v42 }
 0x156   : > { %v1028_v51 = vpack.c.bf16 %v603_v47, %v602_v45  ;;  %v1068_v52 = vpack.c.bf16 %v619_v48, %v618_v46  ;;  %v1166_v53 = vpop.f32.mrb[4].mxu0  ;;  %v1182_v54 = vpop.f32.mrb[4].mxu1 }
 0x157   : > { %1105 = vst [vmem:[%s1687_s24 + $0x8] sm:$0xff] %v1033_v49   ;;  %1113 = vst [vmem:[%s1687_s24 + $0x48] sm:$0xff] %v1073_v50   ;;  %v500_v55 = vadd.f32 %v1166_v53, %v1675_v24  ;;  %v564_v56 = vadd.f32 %v1182_v54, %v1675_v24  ;;  %v491_v57 = vpop.f32.mrb[5].mxu0  ;;  %v555_v58 = vpop.f32.mrb[5].mxu1 }
 0x158   : > { %1029 = vst [vmem:[%s1687_s24] sm:$0xff] %v1028_v51   ;;  %1112 = vst [vmem:[%s1687_s24 + $0x40] sm:$0xff] %v1068_v52   ;;  %v492_v59 = vadd.f32 %v1675_v24, %v491_v57  ;;  %v556_v60 = vadd.f32 %v1675_v24, %v555_v58  ;;  %v1167_v61 = vpop.f32.mrb[6].mxu0  ;;  %v1183_v62 = vpop.f32.mrb[6].mxu1 }
 0x159   : > { %v503_v63 = vadd.f32 %v1167_v61, %v1675_v24  ;;  %v567_v0 = vadd.f32 %v1183_v62, %v1675_v24  ;;  %v494_v1 = vpop.f32.mrb[7].mxu0  ;;  %v558_v2 = vpop.f32.mrb[7].mxu1  ;;  %v608_v5 = vmax.f32 %v500_v55, 0.0  ;;  %v624_v6 = vmax.f32 %v564_v56, 0.0 }
 0x15a   : > { %v495_v3 = vadd.f32 %v1675_v24, %v494_v1  ;;  %v559_v4 = vadd.f32 %v1675_v24, %v558_v2  ;;  %v606_v9 = vmax.f32 %v492_v59, 0.0  ;;  %v622_v10 = vmax.f32 %v556_v60, 0.0 }
 0x15b   : > { %v609_v7 = vmax.f32 %v503_v63, 0.0  ;;  %v625_v8 = vmax.f32 %v567_v0, 0.0 }
 0x15c   : > { %v607_v11 = vmax.f32 %v495_v3, 0.0  ;;  %v623_v12 = vmax.f32 %v559_v4, 0.0 }
 0x15d   : > { %v1043_v13 = vpack.c.bf16 %v609_v7, %v608_v5  ;;  %v1083_v14 = vpack.c.bf16 %v625_v8, %v624_v6 }
 0x15e   : > { %v1038_v15 = vpack.c.bf16 %v607_v11, %v606_v9  ;;  %v1078_v16 = vpack.c.bf16 %v623_v12, %v622_v10  ;;  %v1170_v17 = vpop.f32.mrb[8].mxu0  ;;  %v1186_v18 = vpop.f32.mrb[8].mxu1 }
 0x15f   : > { %1107 = vst [vmem:[%s1687_s24 + $0x18] sm:$0xff] %v1043_v13   ;;  %1115 = vst [vmem:[%s1687_s24 + $0x58] sm:$0xff] %v1083_v14   ;;  %v516_v19 = vadd.f32 %v1170_v17, %v1675_v24  ;;  %v580_v20 = vadd.f32 %v1186_v18, %v1675_v24  ;;  %v507_v21 = vpop.f32.mrb[9].mxu0  ;;  %v571_v22 = vpop.f32.mrb[9].mxu1 }
 0x160   : > { %1106 = vst [vmem:[%s1687_s24 + $0x10] sm:$0xff] %v1038_v15   ;;  %1114 = vst [vmem:[%s1687_s24 + $0x50] sm:$0xff] %v1078_v16   ;;  %v508_v23 = vadd.f32 %v1675_v24, %v507_v21  ;;  %v572_v25 = vadd.f32 %v1675_v24, %v571_v22  ;;  %v1171_v26 = vpop.f32.mrb[10].mxu0  ;;  %v1187_v27 = vpop.f32.mrb[10].mxu1 }
 0x161   : > { %v519_v28 = vadd.f32 %v1171_v26, %v1675_v24  ;;  %v583_v29 = vadd.f32 %v1187_v27, %v1675_v24  ;;  %v510_v30 = vpop.f32.mrb[11].mxu0  ;;  %v574_v31 = vpop.f32.mrb[11].mxu1  ;;  %v612_v34 = vmax.f32 %v516_v19, 0.0  ;;  %v628_v35 = vmax.f32 %v580_v20, 0.0 }
 0x162   : > { %v511_v32 = vadd.f32 %v1675_v24, %v510_v30  ;;  %v575_v33 = vadd.f32 %v1675_v24, %v574_v31  ;;  %v610_v38 = vmax.f32 %v508_v23, 0.0  ;;  %v626_v39 = vmax.f32 %v572_v25, 0.0 }
 0x163   : > { %v613_v36 = vmax.f32 %v519_v28, 0.0  ;;  %v629_v37 = vmax.f32 %v583_v29, 0.0 }
 0x164   : > { %v611_v40 = vmax.f32 %v511_v32, 0.0  ;;  %v627_v41 = vmax.f32 %v575_v33, 0.0 }
 0x165   : > { %v1053_v42 = vpack.c.bf16 %v613_v36, %v612_v34  ;;  %v1093_v43 = vpack.c.bf16 %v629_v37, %v628_v35 }
 0x166   : > { %v1048_v44 = vpack.c.bf16 %v611_v40, %v610_v38  ;;  %v1088_v45 = vpack.c.bf16 %v627_v41, %v626_v39  ;;  %v1174_v46 = vpop.f32.mrb[12].mxu0  ;;  %v1190_v47 = vpop.f32.mrb[12].mxu1 }
 0x167   : > { %1109 = vst [vmem:[%s1687_s24 + $0x28] sm:$0xff] %v1053_v42   ;;  %1117 = vst [vmem:[%s1687_s24 + $0x68] sm:$0xff] %v1093_v43   ;;  %v532_v48 = vadd.f32 %v1174_v46, %v1675_v24  ;;  %v596_v49 = vadd.f32 %v1190_v47, %v1675_v24  ;;  %v523_v50 = vpop.f32.mrb[13].mxu0  ;;  %v587_v51 = vpop.f32.mrb[13].mxu1 }
 0x168   : > { %1108 = vst [vmem:[%s1687_s24 + $0x20] sm:$0xff] %v1048_v44   ;;  %1116 = vst [vmem:[%s1687_s24 + $0x60] sm:$0xff] %v1088_v45   ;;  %v524_v52 = vadd.f32 %v1675_v24, %v523_v50  ;;  %v588_v53 = vadd.f32 %v1675_v24, %v587_v51  ;;  %v1175_v54 = vpop.f32.mrb[14].mxu0  ;;  %v1191_v55 = vpop.f32.mrb[14].mxu1 }
 0x169   : > { %v535_v56 = vadd.f32 %v1175_v54, %v1675_v24  ;;  %v599_v57 = vadd.f32 %v1191_v55, %v1675_v24  ;;  %v526_v58 = vpop.f32.mrb[15].mxu0  ;;  %v590_v59 = vpop.f32.mrb[15].mxu1  ;;  %v616_v62 = vmax.f32 %v532_v48, 0.0  ;;  %v632_v63 = vmax.f32 %v596_v49, 0.0 }
 0x16a   : > { %v527_v60 = vadd.f32 %v1675_v24, %v526_v58  ;;  %v591_v61 = vadd.f32 %v1675_v24, %v590_v59  ;;  %v614_v2 = vmax.f32 %v524_v52, 0.0  ;;  %v630_v3 = vmax.f32 %v588_v53, 0.0 }
 0x16b   : > { %v617_v0 = vmax.f32 %v535_v56, 0.0  ;;  %v633_v1 = vmax.f32 %v599_v57, 0.0 }
 0x16c   : > { %v615_v4 = vmax.f32 %v527_v60, 0.0  ;;  %v631_v5 = vmax.f32 %v591_v61, 0.0 }
 0x16d   : > { %v1063_v6 = vpack.c.bf16 %v617_v0, %v616_v62  ;;  %v1103_v7 = vpack.c.bf16 %v633_v1, %v632_v63 }
 0x16e   : > { %v1058_v24 = vpack.c.bf16 %v615_v4, %v614_v2  ;;  %v1098_v8 = vpack.c.bf16 %v631_v5, %v630_v3 }
 0x16f   : > { %1111 = vst [vmem:[%s1687_s24 + $0x38] sm:$0xff] %v1063_v6   ;;  %1119 = vst [vmem:[%s1687_s24 + $0x78] sm:$0xff] %v1103_v7  }
 0x170   : > { %1110 = vst [vmem:[%s1687_s24 + $0x30] sm:$0xff] %v1058_v24   ;;  %1118 = vst [vmem:[%s1687_s24 + $0x70] sm:$0xff] %v1098_v8  }
 0x171   : > { %1380 = shalt.err (!%p1377_p5)
}
 0x172   : > { %s1381_s6 = scalar_lea.hbm %s1730_s15, 2048  ;;  %s1385_s19 = scalar_lea.hbm %s1788_s3, 4096 }
 0x173   : > { %p1382_p9 = scmp.ne.s32.totalorder %s1730_s15, %s1381_s6  ;;  %p1386_p3 = scmp.lt.u32.totalorder %s1730_s15, %s1788_s3 }
 0x174   : > { %p1387_p7 = scmp.lt.u32.totalorder %s1385_s19, %s1381_s6  ;;  %p1389_p4 = scmp.lt.u32.totalorder %s1381_s6, %s1730_s15 }
 0x175   : > { %p1383_p1 = pnand %p1382_p9, %p1581_p10 }
 0x176   : > { %p1388_p13 = por %p1387_p7, %p1386_p3 }
 0x177   : > { %p1384_p2 = pneg %p1383_p1 }
 0x178   : > { %p1390_p6 = por %p1389_p4, %p1388_p13 }
 0x17a   : > { %p1391_p8 = pnand %p1390_p6, %p1384_p2 }
 0x17c   : > { %1394 = shalt.err (!%p1391_p8)
}
 0x17d   : > { %s1460_s24 = smov 64   ;;  %s1461_s10 = smov 4  }
 0x17e   : > { %1214 = dma.vmem_to_hbm [thread:$0]  (%p1581_p10), %s1732_s11, 2048, %s1730_s15, %s795_s25, %s1460_s24, %s1460_s24, %s1461_s10  }
 0x17f PF: > { %s824_s9 = sand.u32 1, %s1433_s12   ;;  %p1806_p12 = scmp.ne.s32.totalorder %s1796_s23, 0 }
 0x180   : > { %p1807_p11 = scmp.ge.s32.totalorder %s1453_s17, 2  ;;  %s825_s18 = scalar_lea.sflag [#allocation4], %s824_s9 }
 0x182   : > { %p1225_p0 = pnand %p1807_p11, %p1806_p12 }
 0x184   : > { %1428 = dma.done.wait (!%p1225_p0), %s825_s18, 2048  }
 0x185   : > { %1430 = vsyncadd (!%p1225_p0), %s825_s18, 4294965248  ;;  %s20_s17 = sadd.s32 1, %s1453_s17   ;;  %s1808_s12 = smov %s1437_s13 }
 0x186   : > { %p17_p5 = scmp.ge.s32.totalorder %s20_s17, 4   ;;  %s1809_s13 = smov %s1441_s14 }
 0x187   : > { %s1810_s14 = smov %s1590_s5  ;;  %s1811_s15 = smov %s1449_s16 }
 0x188   : > { %s1812_s16 = smov %s1814_s28  ;;  %19 = sbr.rel (!%p17_p5) target bundleno = 7 (0x7), region = 85 }
 0x18f   :  { %830 = vsyncpa [#allocation3], 1 }
 0x190   :  { %832 = vsyncpa [#allocation3 + $0x1], 1 }
 0x191   :  { %833 = vsyncpa [#allocation6], 1 }
 0x192   :  { %834 = vsyncpa [#allocation4], 1 }
 0x193   :  { %836 = vsyncpa [#allocation4 + $0x1], 1 }

</bundles_post_ra>
